<compile_context>
chip_gen: v5e
topology: v5e:2x2
jax: 0.10.0
libtpu: 0.0.40
codegen_flags: <defaults>
</compile_context>

<pallas_src>
import functools

import jax
import jax.numpy as jnp
from jax import lax
from jax.experimental import pallas as pl
from jax.experimental.pallas import tpu as pltpu


def _gca_kernel(hs_ref, ea_ref, lab_ref, wl_ref, bl_ref, wc_ref, o_ref,
                *, inv_temper, num_labels):
    bb, L, H = o_ref.shape
    _, W, E = ea_ref.shape

    hs = hs_ref[...]                      # (bb, L, H) f32
    ea = ea_ref[...]                      # (bb, W, E) f32
    lab = lab_ref[...]                    # (bb, L, W) i32
    wl = wl_ref[...]                      # (E, H) f32
    bl = bl_ref[...]                      # (1, H) f32
    wc = wc_ref[...]                      # (num_labels, H) f32

    # Linear layer, batched over the whole block: (bb*W, E) @ (E, H) + b.
    a = jnp.dot(ea.reshape(bb * W, E), wl,
                preferred_element_type=jnp.float32) + bl
    a = a.reshape(bb, W, H)

    # Attention logits: u[b,l,w] = <hs[b,l,:], a[b,w,:]> / sqrt(H).
    u = jnp.einsum("blh,bwh->blw", hs, a,
                   preferred_element_type=jnp.float32) * inv_temper

    # Masked "softmax" over W — faithful to the PyTorch formula
    # (exp, then mask, then divide by sum + 1e-10; no row-max subtraction).
    mask = (lab > 0).astype(jnp.float32)          # == clamp(lab, 0, 1) for ints
    e = jnp.exp(u) * mask                                       # (bb, L, W)
    s = jnp.sum(e, axis=2, keepdims=True)                       # (bb, L, 1)
    r = pl.reciprocal(s + 1e-10, approx=False)                  # (bb, L, 1)

    # Emb_c gather rewritten as class weights + one small matmul:
    #   cw[b,l,c] = (1/s) * sum_w e[b,l,w] * [lab[b,l,w] == c]
    #   o[b,l,:]  = cw[b,l,:] @ wc
    # (masked positions have lab == 0 but e == 0, so class 0 is not polluted.)
    cls = lax.broadcasted_iota(jnp.int32, (1, 1, 1, num_labels), 3)
    e_cls = jnp.where(lab[..., None] == cls, e[..., None], 0.0)  # (bb, L, W, C)
    cw = jnp.sum(e_cls, axis=2) * r                              # (bb, L, C)

    o = jnp.dot(cw.reshape(bb * L, num_labels), wc,
                preferred_element_type=jnp.float32)              # (bb*L, H)
    o_ref[...] = o.reshape(bb, L, H)


def _pick_batch_block(B, max_block=8):
    """Largest bb <= max_block dividing B while keeping >= 2 grid steps
    (so v7x's two TensorCores both get work)."""
    if B <= 1:
        return 1
    target = max(1, min(max_block, B // 2))
    for bb in range(target, 0, -1):
        if B % bb == 0:
            return bb
    return 1


def gca_forward(word_seq, hidden_state, label_value_matrix,
                emb_a_table, lin_w, lin_b, emb_c_table):
    """word_seq: (B, W) i32; hidden_state: (B, L, H) f32;
       label_value_matrix: (B, L, W) int in [0, 6)."""
    B, W = word_seq.shape
    _, L, H = hidden_state.shape
    E = emb_a_table.shape[1]
    num_labels = emb_c_table.shape[0]

    # Embedding-A gather is parameter-lookup glue; keep it as plain XLA.
    embedding_a = jnp.take(emb_a_table, word_seq, axis=0)     # (B, W, E)
    lin_w_t = lin_w.T                                         # (E, H)
    lin_b_2d = lin_b.reshape(1, H)
    labels = label_value_matrix.astype(jnp.int32)

    bb = _pick_batch_block(B)
    grid = (B // bb,)

    kernel = functools.partial(_gca_kernel,
                               inv_temper=1.0 / (H ** 0.5),
                               num_labels=num_labels)

    out = pl.pallas_call(
        kernel,
        out_shape=jax.ShapeDtypeStruct((B, L, H), jnp.float32),
        grid_spec=pltpu.PrefetchScalarGridSpec(
            num_scalar_prefetch=0,
            grid=grid,
            in_specs=[
                pl.BlockSpec((bb, L, H), lambda b: (b, 0, 0)),        # hidden_state
                pl.BlockSpec((bb, W, E), lambda b: (b, 0, 0)),        # embedding_a
                pl.BlockSpec((bb, L, W), lambda b: (b, 0, 0)),        # labels
                pl.BlockSpec((E, H), lambda b: (0, 0)),               # linear W^T
                pl.BlockSpec((1, H), lambda b: (0, 0)),               # linear bias
                pl.BlockSpec((num_labels, H), lambda b: (0, 0)),      # emb_c table
            ],
            out_specs=pl.BlockSpec((bb, L, H), lambda b: (b, 0, 0)),
        ),
        compiler_params=pltpu.CompilerParams(
            dimension_semantics=("parallel",)),
    )(hidden_state, embedding_a, labels, lin_w_t, lin_b_2d, emb_c_table)
    return out


def gca_reference(word_seq, hidden_state, label_value_matrix,
                  emb_a_table, lin_w, lin_b, emb_c_table):
    H = hidden_state.shape[-1]
    ea = jnp.take(emb_a_table, word_seq, axis=0)                  # (B,W,E)
    a = ea @ lin_w.T + lin_b                                      # (B,W,H)
    u = jnp.einsum("blh,bwh->blw", hidden_state, a) / (H ** 0.5)  # (B,L,W)
    mask = jnp.clip(label_value_matrix, 0, 1).astype(jnp.float32)
    e = jnp.exp(u) * mask
    p = e / (jnp.sum(e, axis=2, keepdims=True) + 1e-10)
    emb_c = jnp.take(emb_c_table, label_value_matrix, axis=0)     # (B,L,W,H)
    return jnp.sum(p[..., None] * emb_c, axis=2)                  # (B,L,H)


if __name__ == "__main__":
    # Small deterministic shapes consistent with the module's forward.
    B, L, W = 2, 8, 16          # batch, hidden-seq len, word-seq len
    H, E = 32, 16               # hidden_size, embedding_dim
    WORD_SIZE, NUM_LABELS = 50, 6

    key = jax.random.PRNGKey(0)
    k1, k2, k3, k4, k5, k6, k7 = jax.random.split(key, 7)

    # Parameters (deterministic init, shapes from __init__).
    emb_a_table = jax.random.normal(k1, (WORD_SIZE, E), jnp.float32) * 0.1
    lin_w = jax.random.normal(k2, (H, E), jnp.float32) * 0.1   # nn.Linear weight (out,in)
    lin_b = jax.random.normal(k3, (H,), jnp.float32) * 0.1
    emb_c_table = jax.random.normal(k4, (NUM_LABELS, H), jnp.float32) * 0.1

    # Inputs.
    word_seq = jax.random.randint(k5, (B, W), 0, WORD_SIZE, jnp.int32)
    hidden_state = jax.random.normal(k6, (B, L, H), jnp.float32)
    label_value_matrix = jax.random.randint(k7, (B, L, W), 0, NUM_LABELS, jnp.int32)

    out = gca_forward(word_seq, hidden_state, label_value_matrix,
                      emb_a_table, lin_w, lin_b, emb_c_table)
    out = jax.block_until_ready(out)

    ref = gca_reference(word_seq, hidden_state, label_value_matrix,
                        emb_a_table, lin_w, lin_b, emb_c_table)
    assert out.shape == (B, L, H)
    assert jnp.allclose(out, ref, atol=1e-4, rtol=1e-4), "mismatch vs reference"
    print("KERNEL_OK")
</pallas_src>

<mosaic_0001>
module attributes {stable_mosaic.version = 11 : i64} {
  func.func @_gca_kernel(%arg0: i32, %arg1: memref<1x8x32xf32, #tpu.memory_space<vmem>>, %arg2: memref<1x16x16xf32, #tpu.memory_space<vmem>>, %arg3: memref<1x8x16xi32, #tpu.memory_space<vmem>>, %arg4: memref<16x32xf32, #tpu.memory_space<vmem>>, %arg5: memref<1x32xf32, #tpu.memory_space<vmem>>, %arg6: memref<6x32xf32, #tpu.memory_space<vmem>>, %arg7: memref<1x8x32xf32, #tpu.memory_space<vmem>>) attributes {dimension_semantics = [#tpu.dimension_semantics<parallel>], iteration_bounds = array<i64: 2>, scalar_prefetch = 0 : i64, scratch_operands = 0 : i64, tpu.core_type = #tpu.core_type<tc>, window_params = [{transform_indices = @transform_0, window_bounds = array<i64: 1, 8, 32>}, {transform_indices = @transform_1, window_bounds = array<i64: 1, 16, 16>}, {transform_indices = @transform_2, window_bounds = array<i64: 1, 8, 16>}, {pipeline_mode = #tpu.pipeline_mode<synchronous>, transform_indices = @transform_3, window_bounds = array<i64: 16, 32>}, {pipeline_mode = #tpu.pipeline_mode<synchronous>, transform_indices = @transform_4, window_bounds = array<i64: 1, 32>}, {pipeline_mode = #tpu.pipeline_mode<synchronous>, transform_indices = @transform_5, window_bounds = array<i64: 6, 32>}, {transform_indices = @transform_6, window_bounds = array<i64: 1, 8, 32>}]} {
    %c0 = arith.constant 0 : index
    %c0_0 = arith.constant 0 : index
    %c0_1 = arith.constant 0 : index
    %0 = vector.load %arg1[%c0, %c0_0, %c0_1] : memref<1x8x32xf32, #tpu.memory_space<vmem>>, vector<1x8x32xf32>
    %c0_2 = arith.constant 0 : index
    %c0_3 = arith.constant 0 : index
    %c0_4 = arith.constant 0 : index
    %1 = vector.load %arg2[%c0_2, %c0_3, %c0_4] : memref<1x16x16xf32, #tpu.memory_space<vmem>>, vector<1x16x16xf32>
    %c0_5 = arith.constant 0 : index
    %c0_6 = arith.constant 0 : index
    %c0_7 = arith.constant 0 : index
    %2 = vector.load %arg3[%c0_5, %c0_6, %c0_7] : memref<1x8x16xi32, #tpu.memory_space<vmem>>, vector<1x8x16xi32>
    %c0_8 = arith.constant 0 : index
    %c0_9 = arith.constant 0 : index
    %3 = vector.load %arg4[%c0_8, %c0_9] : memref<16x32xf32, #tpu.memory_space<vmem>>, vector<16x32xf32>
    %c0_10 = arith.constant 0 : index
    %c0_11 = arith.constant 0 : index
    %4 = vector.load %arg5[%c0_10, %c0_11] : memref<1x32xf32, #tpu.memory_space<vmem>>, vector<1x32xf32>
    %c0_12 = arith.constant 0 : index
    %c0_13 = arith.constant 0 : index
    %5 = vector.load %arg6[%c0_12, %c0_13] : memref<6x32xf32, #tpu.memory_space<vmem>>, vector<6x32xf32>
    %6 = vector.shape_cast %1 : vector<1x16x16xf32> to vector<16x16xf32>
    %cst = arith.constant dense<0.000000e+00> : vector<16x32xf32>
    %7 = tpu.matmul %6, %3, %cst {dimension_numbers = #tpu.dot_dimension_numbers<[1], [0], [0], [1], [0, 0, 1, 1], [], []>} : vector<16x16xf32>, vector<16x32xf32>, vector<16x32xf32> -> vector<16x32xf32>
    %8 = vector.broadcast %4 : vector<1x32xf32> to vector<16x32xf32>
    %9 = arith.addf %7, %8 : vector<16x32xf32>
    %10 = vector.shape_cast %9 : vector<16x32xf32> to vector<1x16x32xf32>
    "tpu.trace_start"() <{level = 10 : i32, message = "blh,bwh->blw"}> : () -> ()
    %cst_14 = arith.constant dense<0.000000e+00> : vector<1x8x16xf32>
    %11 = tpu.matmul %0, %10, %cst_14 {dimension_numbers = #tpu.dot_dimension_numbers<[2], [2], [1], [1], [0, 0, 0, 1, 1, 1], [0], [0]>} : vector<1x8x32xf32>, vector<1x16x32xf32>, vector<1x8x16xf32> -> vector<1x8x16xf32>
    "tpu.trace_stop"() : () -> ()
    %cst_15 = arith.constant 0.176776692 : f32
    %12 = vector.broadcast %cst_15 : f32 to vector<1x8x16xf32>
    %13 = arith.mulf %11, %12 : vector<1x8x16xf32>
    %c0_i32 = arith.constant 0 : i32
    %14 = vector.broadcast %c0_i32 : i32 to vector<1x8x16xi32>
    %15 = arith.cmpi sgt, %2, %14 : vector<1x8x16xi32>
    %16 = arith.extui %15 : vector<1x8x16xi1> to vector<1x8x16xi32>
    %17 = arith.sitofp %16 : vector<1x8x16xi32> to vector<1x8x16xf32>
    %18 = math.exp %13 : vector<1x8x16xf32>
    %19 = arith.mulf %18, %17 : vector<1x8x16xf32>
    %cst_16 = arith.constant dense<0.000000e+00> : vector<1x8xf32>
    %20 = vector.multi_reduction <add>, %19, %cst_16 [2] : vector<1x8x16xf32> to vector<1x8xf32>
    %21 = vector.shape_cast %20 : vector<1x8xf32> to vector<1x8x1xf32>
    %cst_17 = arith.constant 1.000000e-10 : f32
    %22 = vector.broadcast %cst_17 : f32 to vector<1x8x1xf32>
    %23 = arith.addf %21, %22 : vector<1x8x1xf32>
    %24 = tpu.reciprocal %23 : vector<1x8x1xf32> -> vector<1x8x1xf32>
    %25 = tpu.iota {dimensions = array<i32: 3>} : vector<1x1x1x6xi32>
    %26 = vector.shape_cast %2 : vector<1x8x16xi32> to vector<1x8x16x1xi32>
    %27 = vector.broadcast %26 : vector<1x8x16x1xi32> to vector<1x8x16x6xi32>
    %28 = vector.broadcast %25 : vector<1x1x1x6xi32> to vector<1x8x16x6xi32>
    %29 = arith.cmpi eq, %27, %28 : vector<1x8x16x6xi32>
    %30 = vector.shape_cast %19 : vector<1x8x16xf32> to vector<1x8x16x1xf32>
    %cst_18 = arith.constant 0.000000e+00 : f32
    %31 = vector.shape_cast %30 : vector<1x8x16x1xf32> to vector<1x8x16x1xf32>
    %32 = vector.broadcast %31 : vector<1x8x16x1xf32> to vector<1x8x16x6xf32>
    %33 = vector.broadcast %cst_18 : f32 to vector<1x8x16x6xf32>
    %34 = arith.select %29, %32, %33 : vector<1x8x16x6xi1>, vector<1x8x16x6xf32>
    %cst_19 = arith.constant dense<0.000000e+00> : vector<1x8x6xf32>
    %35 = vector.multi_reduction <add>, %34, %cst_19 [2] : vector<1x8x16x6xf32> to vector<1x8x6xf32>
    %36 = vector.broadcast %24 : vector<1x8x1xf32> to vector<1x8x6xf32>
    %37 = arith.mulf %35, %36 : vector<1x8x6xf32>
    %38 = vector.shape_cast %37 : vector<1x8x6xf32> to vector<8x6xf32>
    %cst_20 = arith.constant dense<0.000000e+00> : vector<8x32xf32>
    %39 = tpu.matmul %38, %5, %cst_20 {dimension_numbers = #tpu.dot_dimension_numbers<[1], [0], [0], [1], [0, 0, 1, 1], [], []>} : vector<8x6xf32>, vector<6x32xf32>, vector<8x32xf32> -> vector<8x32xf32>
    %40 = vector.shape_cast %39 : vector<8x32xf32> to vector<1x8x32xf32>
    %c0_21 = arith.constant 0 : index
    %c0_22 = arith.constant 0 : index
    %c0_23 = arith.constant 0 : index
    %41 = vector.load %arg7[%c0_21, %c0_22, %c0_23] : memref<1x8x32xf32, #tpu.memory_space<vmem>>, vector<1x8x32xf32>
    tpu.vector_store %arg7[%c0_21, %c0_22, %c0_23], %40 {strides = array<i32>} : memref<1x8x32xf32, #tpu.memory_space<vmem>>, vector<1x8x32xf32>,
    return
  }
  func.func @transform_0(%arg0: i32) -> (i32, i32, i32) {
    %c0_i32 = arith.constant 0 : i32
    %c0_i32_0 = arith.constant 0 : i32
    %c0_i32_1 = arith.constant 0 : i32
    return %arg0, %c0_i32, %c0_i32_0 : i32, i32, i32
  }
  func.func @transform_1(%arg0: i32) -> (i32, i32, i32) {
    %c0_i32 = arith.constant 0 : i32
    %c0_i32_0 = arith.constant 0 : i32
    %c0_i32_1 = arith.constant 0 : i32
    return %arg0, %c0_i32, %c0_i32_0 : i32, i32, i32
  }
  func.func @transform_2(%arg0: i32) -> (i32, i32, i32) {
    %c0_i32 = arith.constant 0 : i32
    %c0_i32_0 = arith.constant 0 : i32
    %c0_i32_1 = arith.constant 0 : i32
    return %arg0, %c0_i32, %c0_i32_0 : i32, i32, i32
  }
  func.func @transform_3(%arg0: i32) -> (i32, i32) {
    %c0_i32 = arith.constant 0 : i32
    %c0_i32_0 = arith.constant 0 : i32
    %c0_i32_1 = arith.constant 0 : i32
    return %c0_i32, %c0_i32_0 : i32, i32
  }
  func.func @transform_4(%arg0: i32) -> (i32, i32) {
    %c0_i32 = arith.constant 0 : i32
    %c0_i32_0 = arith.constant 0 : i32
    %c0_i32_1 = arith.constant 0 : i32
    return %c0_i32, %c0_i32_0 : i32, i32
  }
  func.func @transform_5(%arg0: i32) -> (i32, i32) {
    %c0_i32 = arith.constant 0 : i32
    %c0_i32_0 = arith.constant 0 : i32
    %c0_i32_1 = arith.constant 0 : i32
    return %c0_i32, %c0_i32_0 : i32, i32
  }
  func.func @transform_6(%arg0: i32) -> (i32, i32, i32) {
    %c0_i32 = arith.constant 0 : i32
    %c0_i32_0 = arith.constant 0 : i32
    %c0_i32_1 = arith.constant 0 : i32
    return %arg0, %c0_i32, %c0_i32_0 : i32, i32, i32
  }
}

</mosaic_0001>

<bundles_post_ra>
// kernel: tpu_custom_call.1
= control target key start
LH: loop header
LB: loop body
LE: loop exit
PB: predicated region body
PF: predicated region fallthrough
CT: control target
= control target key end

     0   :  { %s1776_s0 = inlined_call_operand.hbm [shape: f32[2,8,32], index: 0, kind: input, shape index: {}]   ;;  %s1777_s1 = inlined_call_operand.hbm [shape: f32[2,16,16], index: 1, kind: input, shape index: {}]   ;;  %s1778_s2 = inlined_call_operand.hbm [shape: s32[2,8,16], index: 2, kind: input, shape index: {}]   ;;  %s1779_s3 = inlined_call_operand.hbm [shape: f32[16,32], index: 3, kind: input, shape index: {}]   ;;  %s1780_s4 = inlined_call_operand.vmem [shape: f32[1,32], index: 4, kind: input, shape index: {}]   ;;  %s1781_s5 = inlined_call_operand.hbm [shape: f32[6,32], index: 5, kind: input, shape index: {}]   ;;  %s1782_s6 = inlined_call_operand.hbm [shape: f32[2,8,32], index: 6, kind: output, shape index: {}]  }
   0x1   :  { %1790 = sst [smem:[#allocation20_spill]] %s1777_s1 }
   0x2   :  { %1791 = sst [smem:[#allocation21_spill]] %s1779_s3 }
   0x3   :  { %1792 = sst [smem:[#allocation22_spill]] %s1781_s5 }
   0x4   :  { %11 = vsyncpa [#allocation3], 0 }
   0x5   :  { %13 = vsyncpa [#allocation3 + $0x1], 0 }
   0x6   :  { %14 = vsyncpa [#allocation6], 0 }
   0x7   :  { %16 = vsyncpa [#allocation6 + $0x1], 0 }
   0x8   :  { %17 = vsyncpa [#allocation9], 0 }
   0x9   :  { %18 = vsyncpa [#allocation4], 0 }
   0xa   :  { %20 = vsyncpa [#allocation4 + $0x1], 0  ;;  %s1422_s21 = smov 0   ;;  %s1424_s22 = smov 0  }
   0xb   :  { %s1426_s23 = smov 0   ;;  %s1428_s24 = smov 0  }
   0xc LB: > { %1793 = sst [smem:[#allocation16_spill]] %s1376_s23  ;;  %s1443_s25 = sadd.s32 4294967295, %s1380_s24   ;;  %s1380_s24 = sphi %s1428_s24, %s1812_s24   ;;  %s1376_s23 = sphi %s1426_s23, %s1814_s23   ;;  %s1372_s22 = sphi %s1424_s22, %s1816_s22   ;;  %s1368_s21 = sphi %s1422_s21, %s1815_s21  }
   0xd   : > { %s1017_s26 = sadd.s32 4294967294, %s1380_s24   ;;  %p46_p0 = scmp.ne.s32.totalorder %s1372_s22, %s1368_s21 }
   0xe   : > { %p1789_p1 = scmp.eq.s32.totalorder %s1443_s25, 0  ;;  %p185_p2 = scmp.eq.s32.totalorder %s1443_s25, 1 }
   0xf   : > { %p191_p3 = scmp.eq.s32.totalorder %s1017_s26, 1  ;;  %p1018_p5 = scmp.ge.s32.totalorder %s1380_s24, 1 }
  0x10   : > { %p1452_p4 = por %p1789_p1, %p46_p0  ;;  %p198_p7 = scmp.lt.s32.totalorder %s1380_s24, 3 }
  0x11   : > { %p1457_p6 = por %p191_p3, %p46_p0  ;;  %s1797_s3 = sld [smem:[#allocation21_spill]] }
  0x12   : > { %p1465_p8 = pnand %p1018_p5, %p198_p7  ;;  %s1382_s9 = smov [#allocation8]  }
  0x13   : > { %s1795_s28 = scalar_select %p1457_p6, 1, 0 }
  0x14   : > { %p1067_p9 = pneg %p1465_p8  ;;  %s211_s10 = sshll.u32 %s1382_s9, 4  ;;  %s212_s10 = int_to_ptr.vmem [resolvable:$true] %s211_s10 }
  0x15   : > { %1796 = sst [smem:[#allocation17_spill]] %s1795_s28  ;;  %s1479_s12 = sadd.s32 1, %s1380_s24  }
  0x16   : > { %p1473_p10 = pnand %p1067_p9, %p1789_p1  ;;  %1800 = sst [smem:[#allocation18_spill]] %s1479_s12 }
  0x17   : > { %s209_s7 = sshll.u32 %s1797_s3, 4  ;;  %s1783_s13 = smov 128   ;;  %s210_s7 = int_to_ptr.hbm [resolvable:$true] %s209_s7 }
  0x18   : > { %s1784_s14 = smov 8   ;;  %s30_s15 = ssub.s32 %s1380_s24, %s1479_s12 }
  0x19   : > { %1070 = dma.hbm_to_vmem [thread:$0]  (!%p1473_p10), %s210_s7, 256, %s212_s10, [#allocation9], %s1783_s13, %s1783_s13, %s1784_s14  }
  0x1a   : > { %s33_s16 = sadd.s32 1, %s1376_s23  ;;  %p31_p12 = scmp.eq.s32.totalorder %s30_s15, 0 }
  0x1b   : > { %p40_p13 = scmp.ne.s32.totalorder %s1376_s23, %s1372_s22  ;;  %p41_p0 = scmp.eq.s32.totalorder %s1380_s24, 0 }
  0x1c   : > { %p1090_p3 = scmp.lt.s32.totalorder %s1380_s24, 2  ;;  %s1503_s19 = sand.u32 1, %s1376_s23  }
  0x1d   : > { %s1494_s17 = scalar_select %p31_p12, %s1376_s23, %s33_s16  }
  0x1e   : > { %p42_p5 = por %p41_p0, %p40_p13  ;;  %p1498_p7 = por %p185_p2, %p40_p13 }
  0x1f   : > { %1801 = sst [smem:[#allocation19_spill]] %s1494_s17  ;;  %s259_s20 = sand.u32 1, %s1380_s24  }
  0x20   : > { %p1506_p9 = pnand %p1090_p3, %p42_p5  ;;  %s1024_s29 = sshll.u32 %s1503_s19, 4 }
  0x21   : > { %s1048_s30 = sshll.u32 %s1380_s24, 4  ;;  %s1804_s1 = sld [smem:[#allocation20_spill]] }
  0x22   : > { %s263_s15 = scalar_lea.vmem [#allocation5], %s1024_s29  ;;  %s1805_s5 = sld [smem:[#allocation22_spill]] }
  0x23   : > { %s271_s16 = sshll.u32 %s263_s15, 4  ;;  %s1518_s23 = scalar_lea.sflag [#allocation6], %s259_s20  ;;  %s272_s16 = int_to_ptr.vmem [resolvable:$true] %s271_s16 }
  0x24   : > { %p1190_p12 = pneg %p1506_p9 }
  0x27   : > { %s268_s10 = scalar_lea.hbm %s1804_s1, %s1048_s30  ;;  %s1193_s7 = scalar_lea.hbm %s1804_s1, 32 }
  0x28   : > { %s269_s13 = sshll.u32 %s268_s10, 4  ;;  %s227_s17 = sshll.u32 %s1805_s5, 4  ;;  %s270_s13 = int_to_ptr.hbm [resolvable:$true] %s269_s13  ;;  %s228_s17 = int_to_ptr.hbm [resolvable:$true] %s227_s17 }
  0x29   : > { %s1186_s12 = sshra.s32 %s270_s13, 4  ;;  %s1187_s12 = int_to_ptr.hbm [resolvable:$true] %s1186_s12 }
  0x2a   : > { %s1188_s28 = scalar_lea.hbm %s1187_s12, 16  ;;  %p1194_p3 = scmp.lt.s32.totalorder %s1187_s12, %s1804_s1 }
  0x2b   : > { %p1189_p2 = scmp.ne.s32.totalorder %s1187_s12, %s1188_s28  ;;  %p1195_p5 = scmp.lt.s32.totalorder %s1193_s7, %s1188_s28 }
  0x2d   : > { %p1191_p13 = pnand %p1190_p12, %p1189_p2  ;;  %p1196_p11 = por %p1195_p5, %p1194_p3 }
  0x2f   : > { %p1192_p0 = pneg %p1191_p13 }
  0x31   : > { %p1197_p1 = pnand %p1196_p11, %p1192_p0 }
  0x33   : > { %1200 = shalt.err (!%p1197_p1)
}
  0x34   : > { %s1806_s3 = smov 8   ;;  %s1807_s14 = smov 128  }
  0x35   : > { %1080 = dma.hbm_to_vmem [thread:$0]  (!%p1506_p9), %s270_s13, 256, %s272_s16, %s1518_s23, %s1807_s14, %s1807_s14, %s1806_s3  }
  0x36   : > { %s1385_s20 = smov [#allocation10]   ;;  %s1022_s28 = sshll.u32 %s1503_s19, 3 }
  0x37   : > { %s229_s15 = sshll.u32 %s1385_s20, 4  ;;  %s1023_s12 = sshll.u32 %s1380_s24, 3  ;;  %s230_s15 = int_to_ptr.vmem [resolvable:$true] %s229_s15 }
  0x38   : > { %1073 = dma.hbm_to_vmem [thread:$0]  (!%p1473_p10), %s228_s17, 128, %s230_s15, [#allocation9]  }
  0x39   : > { %s248_s7 = scalar_lea.hbm %s1776_s0, %s1023_s12  ;;  %s244_s9 = scalar_lea.vmem [#allocation2], %s1022_s28 }
  0x3a   : > { %s252_s10 = sshll.u32 %s244_s9, 4  ;;  %s250_s1 = sshll.u32 %s248_s7, 4  ;;  %s253_s10 = int_to_ptr.vmem [resolvable:$true] %s252_s10  ;;  %s251_s1 = int_to_ptr.hbm [resolvable:$true] %s250_s1 }
  0x3b   : > { %s241_s5 = scalar_lea.sflag [#allocation3], %s1503_s19  ;;  %s1246_s13 = sshra.s32 %s251_s1, 4  ;;  %s1247_s13 = int_to_ptr.hbm [resolvable:$true] %s1246_s13 }
  0x3c   : > { %s1248_s16 = scalar_lea.hbm %s1247_s13, 8  ;;  %s1253_s3 = scalar_lea.hbm %s1776_s0, 16 }
  0x3d   : > { %p1249_p1 = scmp.ne.s32.totalorder %s1247_s13, %s1248_s16  ;;  %p1254_p10 = scmp.lt.s32.totalorder %s1247_s13, %s1776_s0 }
  0x3e   : > { %p1255_p13 = scmp.lt.s32.totalorder %s1253_s3, %s1248_s16 }
  0x3f   : > { %p1251_p11 = pnand %p1249_p1, %p1190_p12 }
  0x40   : > { %p1256_p0 = por %p1255_p13, %p1254_p10 }
  0x41   : > { %p1252_p2 = pneg %p1251_p11 }
  0x43   : > { %p1257_p3 = pnand %p1256_p0, %p1252_p2 }
  0x45   : > { %1260 = shalt.err (!%p1257_p3)
}
  0x46   : > { %1077 = dma.hbm_to_vmem [thread:$0]  (!%p1506_p9), %s251_s1, 128, %s253_s10, %s241_s5  }
  0x47   : > { %s289_s29 = scalar_lea.hbm %s1778_s2, %s1023_s12  ;;  %s285_s30 = scalar_lea.vmem [#allocation7], %s1022_s28 }
  0x48   : > { %s293_s7 = sshll.u32 %s285_s30, 4  ;;  %s291_s9 = sshll.u32 %s289_s29, 4  ;;  %s294_s7 = int_to_ptr.vmem [resolvable:$true] %s293_s7  ;;  %s292_s9 = int_to_ptr.hbm [resolvable:$true] %s291_s9 }
  0x49   : > { %s1276_s11 = sshra.s32 %s292_s9, 4  ;;  %s1283_s1 = scalar_lea.hbm %s1778_s2, 16  ;;  %s1277_s11 = int_to_ptr.hbm [resolvable:$true] %s1276_s11 }
  0x4a   : > { %s1278_s13 = scalar_lea.hbm %s1277_s11, 8  ;;  %p1284_p2 = scmp.lt.s32.totalorder %s1277_s11, %s1778_s2 }
  0x4b   : > { %p1279_p5 = scmp.ne.s32.totalorder %s1277_s11, %s1278_s13  ;;  %p1285_p10 = scmp.lt.s32.totalorder %s1283_s1, %s1278_s13 }
  0x4d   : > { %p1281_p1 = pnand %p1279_p5, %p1190_p12  ;;  %p1286_p13 = por %p1285_p10, %p1284_p2 }
  0x4f   : > { %p1282_p11 = pneg %p1281_p1 }
  0x51   : > { %p1287_p0 = pnand %p1286_p13, %p1282_p11 }
  0x53   : > { %1290 = shalt.err (!%p1287_p0)
}
  0x54   : > { %1083 = dma.hbm_to_vmem [thread:$0]  (!%p1506_p9), %s292_s9, 128, %s294_s7, %s1518_s23  }
  0x55   : > { %302 = sbr.rel (%p1465_p8) target bundleno = 742 (0x2e6), region = 44  ;;  %s1574_s28 = sand.u32 (!%p1465_p8), 1, %s1372_s22  }
  0x56   : > { %s1577_s12 = sshll.u32 (!%p1465_p8), %s1574_s28, 3  ;;  %s305_s3 = scalar_lea.sflag (!%p1465_p8), [#allocation3], %s1574_s28 }
  0x57   : > { %s308_s14 = scalar_lea.vmem (!%p1465_p8), [#allocation2], %s1577_s12 }
  0x5a   : > { %1351 = dma.done.wait (%p1452_p4), %s305_s3, 128  }
  0x5b   : > { %1353 = vsyncadd (%p1452_p4), %s305_s3, 4294967168  ;;  %s314_s23 = sand.u32 1, %s1443_s25   ;;  %s1031_s8 = sshll.u32 %s1574_s28, 4 }
  0x5c   : > { %s315_s26 = scalar_lea.sflag [#allocation6], %s314_s23  ;;  %s318_s20 = scalar_lea.vmem [#allocation5], %s1031_s8 }
  0x5d   : > { %1355 = dma.done.wait (%p1452_p4), %s315_s26, 384  }
  0x5e   : > { %1357 = vsyncadd (%p1452_p4), %s315_s26, 4294966912  ;;  %s328_s19 = scalar_lea.vmem [#allocation7], %s1577_s12  ;;  %p1808_p8 = scmp.eq.s32.totalorder %s1443_s25, 0 }
  0x60   : > { %1359 = dma.done.wait (%p1808_p8), [#allocation9], 384   ;;  %p1809_p9 = pmov %p1808_p8 }
  0x61   : > { %v383_v0 = vld [vmem:[#allocation8 + $0x8] sm:$0xff]  ;;  %v382_v1 = vld [vmem:[#allocation8] sm:$0xff]  ;;  %vm389_vm0 = vcmask 130048   ;;  %v474_v4 = vlaneseq  ;;  %v381_v7 = vld [vmem:[%s328_s19] sm:$0xff]  ;;  %vm419_vm1 = vcmask 261120   ;;  %v1386_v27 = vmov 0.0  }
  0x62   : > { %1361 = vsyncadd (%p1809_p9), [#allocation9], 4294966912  ;;  %1049 = vmatpush.msra.mxu3 %v383_v0  ;;  %v380_v2 = vld [vmem:[%s318_s20 + $0x8] sm:$0xff]  ;;  %410 = vmatpush.msra.mxu0 %v383_v0  ;;  %v379_v3 = vld [vmem:[%s318_s20] sm:$0xff]  ;;  %v502_v8 = vperm.slane %v381_v7, 2  ;;  %v476_v9 = vperm.slane %v381_v7, 0 }
  0x63   : > { %v1598_v5 = vshrl.u32 %v474_v4, 7  ;;  %v528_v10 = vperm.slane %v381_v7, 4  ;;  %v554_v11 = vperm.slane %v381_v7, 6  ;;  %v1151_v12 = vld [vmem:[%s1780_s4] ss:$0 sm:$0xff]  ;;  %v489_v16 = vperm.slane %v381_v7, 1 }
  0x64   : > { %1050 = vmatpush.msra.mxu3 %v382_v1  ;;  %411 = vmatpush.msra.mxu0 %v382_v1  ;;  %v378_v18 = vld [vmem:[%s308_s14] sm:$0xff]  ;;  %v515_v19 = vperm.slane %v381_v7, 3  ;;  %v541_v20 = vperm.slane %v381_v7, 5  ;;  %v567_v21 = vperm.slane %v381_v7, 7  ;;  %v1622_v25 = vand.u32 127, %v474_v4  ;;  %s1045_s29 = sshll.u32 %s1443_s25, 3 }
  0x65   : > { %1037 = vmatmul.msk.f32.vlgmr.msra.gmra.mxu3 %vm389_vm0, %v380_v2  ;;  %1036 = vmatmul.msk.f32.vlgmr.msra.gmra.mxu0 %vm389_vm0, %v379_v3  ;;  %v1603_v6 = vadd.s32 8, %v1598_v5  ;;  %vm450_vm2 = vcmp.gt.s32.totalorder %v381_v7, 0  ;;  %vm716_vm13 = vcmask 48128   ;;  %s880_s9 = scalar_lea.hbm %s1782_s6, %s1045_s29  ;;  %s377_s11 = scalar_lea.vmem [#allocation11], %s1577_s12 }
  0x66   : > { %1131 = vset.pattern.permute.xlu1 %v1598_v5  ;;  %1132 = vset.pattern.permute.xlu2 %v1598_v5  ;;  %v1041_v28 = vsel %vm450_vm2, 1.0, %v1386_v27  ;;  %s882_s13 = sshll.u32 %s377_s11, 4  ;;  %s884_s16 = sshll.u32 %s880_s9, 4  ;;  %s883_s13 = int_to_ptr.vmem [resolvable:$true] %s882_s13  ;;  %s885_s16 = int_to_ptr.hbm [resolvable:$true] %s884_s16 }
  0x67   : > { %1136 = vset.pattern.permute.xlu0 %v1603_v6  ;;  %s870_s17 = scalar_lea.sflag [#allocation4], %s1574_s28  ;;  %s1320_s1 = sshra.s32 %s885_s16, 4  ;;  %s1321_s1 = int_to_ptr.hbm [resolvable:$true] %s1320_s1 }
  0x68   : > { %s1322_s5 = scalar_lea.hbm %s1321_s1, 8  ;;  %s1326_s3 = scalar_lea.hbm %s1782_s6, 16 }
  0x69   : > { %p1323_p4 = scmp.ne.s32.totalorder %s1321_s1, %s1322_s5  ;;  %p1327_p5 = scmp.lt.s32.totalorder %s1321_s1, %s1782_s6 }
  0x6a   : > { %p1328_p1 = scmp.lt.s32.totalorder %s1326_s3, %s1322_s5 }
  0x6b   : > { %p1324_p12 = pnand %p1323_p4, %p1498_p7 }
  0x6c   : > { %p1329_p11 = por %p1328_p1, %p1327_p5 }
  0x6d   : > { %p1325_p3 = pneg %p1324_p12 }
  0x6e   : > { %507 = vperm.xlu1 %1131, %v502_v8   ;;  %481 = vperm.xlu2 %1132, %v476_v9  }
  0x6f   : > { %539 = vperm.xlu0 %1136, %v528_v10   ;;  %p1330_p2 = pnand %p1329_p11, %p1325_p3 }
  0x76   : > { %1133 = vset.pattern.permute.xlu1 %v1603_v6  ;;  %1134 = vset.pattern.permute.xlu2 %v1603_v6 }
  0x77   : > { %565 = vperm.xlu0 %1136, %v554_v11  }
  0x7e   : > { %500 = vperm.xlu1 %1133, %v489_v16   ;;  %513 = vperm.xlu2 %1134, %v502_v8  }
  0x7f   : > { %1137 = vset.pattern.permute.xlu0 %v1598_v5 }
  0x86   : > { %487 = vperm.xlu1 %1133, %v476_v9   ;;  %1135 = vset.pattern.permute.xlu2 %v1598_v5 }
  0x87   : > { %494 = vperm.xlu0 %1137, %v489_v16  }
  0x8e   : > { %526 = vperm.xlu1 %1133, %v515_v19   ;;  %520 = vperm.xlu2 %1135, %v515_v19  }
  0x8f   : > { %546 = vperm.xlu0 %1137, %v541_v20  }
  0x96   : > { %552 = vperm.xlu1 %1133, %v541_v20   ;;  %533 = vperm.xlu2 %1135, %v528_v10  }
  0x9e   : > { %559 = vperm.xlu2 %1135, %v554_v11   ;;  %1138 = vset.pattern.permute.xlu1 %v1598_v5 }
  0xa6   : > { %1139 = vset.pattern.permute.xlu2 %v1603_v6  ;;  %572 = vperm.xlu1 %1138, %v567_v21  }
  0xae   : > { %578 = vperm.xlu2 %1139, %v567_v21   ;;  %1141 = vset.pattern.permute.xlu1 %v1603_v6 }
  0xb6   : > { %1140 = vset.pattern.permute.xlu2 %v1598_v5 }
  0xc8   : > { %v1632_v36 = vpop.permute.xlu2 %481 }
  0xc9   : > { %vm580_vm6 = vcmp.eq.s32.totalorder %v1632_v36, %v1622_v25 }
  0xd8   : > { %v514_v38 = vpop.permute.xlu2 %513 }
  0xd9   : > { %vm585_vm8 = vcmp.eq.s32.totalorder %v514_v38, %v1622_v25 }
  0xe0   : > { %v1624_v26 = vpop.permute.xlu1 %507 }
  0xe1   : > { %vm584_vm3 = vcmp.eq.s32.totalorder %v1624_v26, %v1622_v25  ;;  %v1664_v47 = vpop.permute.xlu0 %539 }
  0xe2   : > { %v413_v14 = vpop.f32.mrf.mxu0 }
  0xe3   : > { %v414_v17 = vadd.f32 %v1151_v12, %v413_v14 }
  0xe8   : > { %v416_v13 = vpop.f32.mrf.mxu3  ;;  %v1647_v42 = vpop.permute.xlu2 %520 }
  0xe9   : > { %v417_v15 = vadd.f32 %v1151_v12, %v416_v13  ;;  %vm586_vm10 = vcmp.eq.s32.totalorder %v1647_v42, %v1622_v25  ;;  %v1666_v49 = vpop.permute.xlu0 %565 }
  0xeb   : > { %1038 = vmatpush.xpose.msk.msra.mxu1 %vm419_vm1, %v417_v15 }
  0xef   : > { %1039 = vmatpush.xpose.msk.msra.mxu1 %vm419_vm1, %v414_v17 }
  0xf0   : > { %v501_v33 = vpop.permute.xlu1 %500  ;;  %v1654_v44 = vpop.permute.xlu2 %533 }
  0xf1   : > { %vm583_vm4 = vcmp.eq.s32.totalorder %v501_v33, %v1622_v25  ;;  %vm588_vm11 = vcmp.eq.s32.totalorder %v1654_v44, %v1622_v25 }
  0xf2   : > { %1040 = vmatmul.msk.f32.vlgmr.msra.gmra.mxu1 %vm419_vm1, %v378_v18 }
  0xf8   : > { %v1630_v35 = vpop.permute.xlu1 %487  ;;  %v1668_v50 = vpop.permute.xlu2 %559 }
  0xf9   : > { %vm581_vm5 = vcmp.eq.s32.totalorder %v1630_v35, %v1622_v25  ;;  %v495_v51 = vpop.permute.xlu0 %494 }
  0xfa   : > { %vm582_vm12 = vcmp.eq.s32.totalorder %v495_v51, %v1622_v25 }
 0x100   : > { %v1640_v37 = vpop.permute.xlu1 %526 }
 0x101   : > { %vm587_vm7 = vcmp.eq.s32.totalorder %v1640_v37, %v1622_v25  ;;  %v1672_v53 = vpop.permute.xlu0 %546 }
 0x108   : > { %v1645_v41 = vpop.permute.xlu1 %552  ;;  %v1670_v52 = vpop.permute.xlu2 %578 }
 0x109   : > { %vm591_vm9 = vcmp.eq.s32.totalorder %v1645_v41, %v1622_v25 }
 0x118   : > { %v1674_v54 = vpop.permute.xlu1 %572 }
 0x16f   : > { %v446_v22 = vpop.f32.mrf.mxu1 }
 0x170   : > { %v449_v23 = vmul.f32 0.17677669, %v446_v22 }
 0x172   : > { %v453_v24 = vmul.f32 1.442695, %v449_v23 }
 0x174   : > { %1152 = vpow2.f32 %v453_v24 }
 0x17a   : > { %v1153_v29 = vpop.eup %1152 }
 0x17b   : > { %v455_v30 = vmul.f32 %v1153_v29, %v1041_v28 }
 0x17d   : > { %v456_v31 = vsel %vm389_vm0, %v455_v30, 0.0  ;;  %v609_v32 = vperm.slane %v455_v30, 1  ;;  %v622_v34 = vperm.slane %v455_v30, 2  ;;  %v674_v39 = vperm.slane %v455_v30, 6 }
 0x17e   : > { %457 = vadd.xlane.f32.xlu0 %v456_v31  ;;  %v596_v40 = vperm.slane %v455_v30, 0  ;;  %v635_v43 = vperm.slane %v455_v30, 3  ;;  %v648_v45 = vperm.slane %v455_v30, 4  ;;  %v661_v46 = vperm.slane %v455_v30, 5 }
 0x17f   : > { %620 = vperm.xlu1 %1141, %v609_v32   ;;  %614 = vperm.xlu2 %1140, %v609_v32   ;;  %v687_v48 = vperm.slane %v455_v30, 7 }
 0x187   : > { %633 = vperm.xlu1 %1141, %v622_v34   ;;  %627 = vperm.xlu2 %1140, %v622_v34  }
 0x18f   : > { %1142 = vset.pattern.permute.xlu1 %v1598_v5  ;;  %1143 = vset.pattern.permute.xlu2 %v1603_v6 }
 0x192   : > { %679 = vperm.xlu0 %1137, %v674_v39  }
 0x197   : > { %607 = vperm.xlu2 %1143, %v596_v40   ;;  %601 = vperm.xlu1 %1142, %v596_v40  }
 0x19a   : > { %1150 = vset.pattern.permute.xlu0 %v1603_v6 }
 0x19f   : > { %646 = vperm.xlu2 %1143, %v635_v43   ;;  %640 = vperm.xlu1 %1142, %v635_v43  }
 0x1a7   : > { %1144 = vset.pattern.permute.xlu2 %v1598_v5  ;;  %1145 = vset.pattern.permute.xlu1 %v1603_v6 }
 0x1af   : > { %653 = vperm.xlu2 %1144, %v648_v45   ;;  %659 = vperm.xlu1 %1145, %v648_v45  }
 0x1b7   : > { %1147 = vset.pattern.permute.xlu2 %v1603_v6  ;;  %1146 = vset.pattern.permute.xlu1 %v1598_v5 }
 0x1bf   : > { %672 = vperm.xlu2 %1147, %v661_v46   ;;  %666 = vperm.xlu1 %1146, %v661_v46  }
 0x1c7   : > { %1149 = vset.pattern.permute.xlu2 %v1598_v5  ;;  %1148 = vset.pattern.permute.xlu1 %v1603_v6 }
 0x1cf   : > { %692 = vperm.xlu2 %1149, %v687_v48   ;;  %685 = vperm.xlu1 %1148, %v674_v39  }
 0x1d7   : > { %698 = vperm.xlu1 %1148, %v687_v48  }
 0x1d9   : > { %v615_v55 = vpop.permute.xlu2 %614 }
 0x1da   : > { %v702_v56 = vsel %vm582_vm12, %v615_v55, 0.0  ;;  %vm834_vm12 = vcmask 1045509  }
 0x1db   : > { %v726_v60 = vsel %vm716_vm13, %v702_v56, 0.0 }
 0x1e1   : > { %v628_v0 = vpop.permute.xlu2 %627 }
 0x1e2   : > { %v704_v1 = vsel %vm584_vm3, %v628_v0, 0.0  ;;  %vm822_vm3 = vcmask 1041409  }
 0x1e3   : > { %v735_v5 = vsel %vm716_vm13, %v704_v1, 0.0 }
 0x1f1   : > { %v621_v57 = vpop.permute.xlu1 %620  ;;  %v458_v59 = vpop.xlane.xlu0 %457 }
 0x1f2   : > { %v703_v58 = vsel %vm583_vm4, %v621_v57, 0.0  ;;  %v459_v62 = vadd.f32 1e-10, %v458_v59  ;;  %v608_v12 = vpop.permute.xlu2 %607  ;;  %vm825_vm4 = vcmask 1042434  }
 0x1f3   : > { %v727_v61 = vsel %vm716_vm13, %v703_v58, 0.0  ;;  %v701_v18 = vsel %vm581_vm5, %v608_v12, 0.0  ;;  %vm589_vm5 = vcmp.eq.s32.totalorder %v1664_v47, %v1622_v25 }
 0x1f4   : > { %v728_v63 = vadd.f32 %v727_v61, %v726_v60  ;;  %1154 = vrcp.f32 %v459_v62  ;;  %v471_v20 = vand.u32 2147483648, %v459_v62  ;;  %vm465_vm15 = vweird.f32 %v459_v62 }
 0x1f5   : > { %v469_v22 = vand.u32 2147483647, %v459_v62  ;;  %v718_v24 = vsel %vm716_vm13, %v701_v18, 0.0 }
 0x1f6   : > { %v729_v10 = vrot.slane %v728_v63, 4  ;;  %v472_v31 = vor.u32 1.1754944e-38, %v471_v20 }
 0x1f7   : > { %vm470_vm2 = vcmp.eq.f32.partialorder %v469_v22, 8.507059e+37 }
 0x1f8   : > { %v730_v14 = vadd.f32 %v729_v10, %v728_v63 }
 0x1f9   : > { %v634_v2 = vpop.permute.xlu1 %633 }
 0x1fa   : > { %v705_v3 = vsel %vm585_vm8, %v634_v2, 0.0  ;;  %v1155_v4 = vpop.eup %1154  ;;  %v731_v17 = vrot.slane %v730_v14, 2  ;;  %v647_v32 = vpop.permute.xlu2 %646  ;;  %vm831_vm8 = vcmask 1044484  }
 0x1fb   : > { %v736_v6 = vsel %vm716_vm13, %v705_v3, 0.0  ;;  %v461_v7 = vmul.f32 %v1155_v4, %v459_v62  ;;  %vm466_vm14 = vweird.f32 %v1155_v4  ;;  %v707_v36 = vsel %vm587_vm7, %v647_v32, 0.0 }
 0x1fc   : > { %v737_v8 = vadd.f32 %v736_v6, %v735_v5  ;;  %vm467_vm0 = vmor %vm465_vm15, %vm466_vm14  ;;  %v732_v28 = vadd.f32 %v731_v17, %v730_v14  ;;  %v745_v51 = vsel %vm716_vm13, %v707_v36, 0.0  ;;  %vm590_vm7 = vcmp.eq.s32.totalorder %v1672_v53, %v1622_v25 }
 0x1fd   : > { %v462_v11 = vsub.f32 1.0, %v461_v7  ;;  %vm594_vm14 = vcmp.eq.s32.totalorder %v1674_v54, %v1622_v25  ;;  %vm595_vm15 = vcmp.eq.s32.totalorder %v1670_v52, %v1622_v25 }
 0x1fe   : > { %v738_v9 = vrot.slane %v737_v8, 4  ;;  %v733_v38 = vrot.slane %v732_v28, 1 }
 0x1ff   : > { %v463_v15 = vmul.f32 %v1155_v4, %v462_v11 }
 0x200   : > { %v739_v13 = vadd.f32 %v738_v9, %v737_v8  ;;  %v734_v56 = vadd.f32 %v733_v38, %v732_v28 }
 0x201   : > { %v464_v19 = vadd.f32 %v1155_v4, %v463_v15 }
 0x202   : > { %v740_v16 = vrot.slane %v739_v13, 2 }
 0x203   : > { %v468_v29 = vsel %vm467_vm0, %v1155_v4, %v464_v19  ;;  %vm837_vm0 = vcmask 1046534  }
 0x204   : > { %v741_v26 = vadd.f32 %v740_v16, %v739_v13  ;;  %v1696_v34 = vsel %vm470_vm2, %v472_v31, %v468_v29  ;;  %vm840_vm2 = vcmask 1047559  }
 0x205   : > { %v790_v45 = vrot.slane %v1696_v34, 1  ;;  %v791_v37 = vrot.slane %v1696_v34, 2  ;;  %v792_v11 = vrot.slane %v1696_v34, 3  ;;  %v795_v54 = vrot.slane %v1696_v34, 6 }
 0x206   : > { %v742_v35 = vrot.slane %v741_v26, 1 }
 0x207   : > { %v806_v60 = vmul.f32 %v790_v45, %v734_v56  ;;  %v680_v45 = vpop.permute.xlu0 %679 }
 0x208   : > { %v743_v48 = vadd.f32 %v742_v35, %v741_v26 }
 0x209   : > { %v602_v21 = vpop.permute.xlu1 %601  ;;  %v821_v1 = vrot.slane %v806_v60, 7  ;;  %v654_v6 = vpop.permute.xlu2 %653 }
 0x20a   : > { %v700_v23 = vsel %vm580_vm6, %v602_v21, 0.0  ;;  %v807_v62 = vmul.f32 %v791_v37, %v743_v48  ;;  %v708_v9 = vsel %vm588_vm11, %v654_v6, 0.0  ;;  %vm828_vm6 = vcmask 1043459  }
 0x20b   : > { %v717_v27 = vsel %vm716_vm13, %v700_v23, 0.0  ;;  %v753_v15 = vsel %vm716_vm13, %v708_v9, 0.0  ;;  %vm593_vm11 = vcmp.eq.s32.totalorder %v1666_v49, %v1622_v25 }
 0x20c   : > { %v719_v30 = vadd.f32 %v718_v24, %v717_v27  ;;  %v824_v3 = vrot.slane %v807_v62, 6  ;;  %v793_v27 = vrot.slane %v1696_v34, 4 }
 0x20e   : > { %v720_v33 = vrot.slane %v719_v30, 4 }
 0x210   : > { %v721_v39 = vadd.f32 %v720_v33, %v719_v30 }
 0x211   : > { %v641_v40 = vpop.permute.xlu1 %640 }
 0x212   : > { %v722_v43 = vrot.slane %v721_v39, 2  ;;  %v706_v46 = vsel %vm586_vm10, %v641_v40, 0.0  ;;  %vm592_vm10 = vcmp.eq.s32.totalorder %v1668_v50, %v1622_v25 }
 0x213   : > { %v744_v55 = vsel %vm716_vm13, %v706_v46, 0.0  ;;  %v712_v46 = vsel %vm592_vm10, %v680_v45, 0.0 }
 0x214   : > { %v723_v57 = vadd.f32 %v722_v43, %v721_v39  ;;  %v746_v58 = vadd.f32 %v745_v51, %v744_v55  ;;  %v385_v39 = vld [vmem:[#allocation10] sm:$0x3f]  ;;  %v794_v51 = vrot.slane %v1696_v34, 5 }
 0x216   : > { %v724_v59 = vrot.slane %v723_v57, 1  ;;  %v747_v61 = vrot.slane %v746_v58, 4 }
 0x218   : > { %v725_v63 = vadd.f32 %v724_v59, %v723_v57  ;;  %v748_v0 = vadd.f32 %v747_v61, %v746_v58  ;;  %v771_v58 = vsel %vm716_vm13, %v712_v46, 0.0 }
 0x219   : > { %v673_v23 = vpop.permute.xlu2 %672 }
 0x21a   : > { %v805_v42 = vmul.f32 %v725_v63, %v1696_v34  ;;  %v749_v2 = vrot.slane %v748_v0, 2  ;;  %v711_v47 = vsel %vm591_vm9, %v673_v23, 0.0  ;;  %vm844_vm9 = vcmask 1045504  }
 0x21b   : > { %v763_v31 = vsel %vm716_vm13, %v711_v47, 0.0  ;;  %1042 = vmatpush.msk.msra.mxu2 %vm844_vm9, %v385_v39 }
 0x21c   : > { %v823_v4 = vsel %vm822_vm3, %v821_v1, %v805_v42  ;;  %v750_v5 = vadd.f32 %v749_v2, %v748_v0 }
 0x21d   : > { %v826_v7 = vsel %vm825_vm4, %v824_v3, %v823_v4 }
 0x21e   : > { %v751_v8 = vrot.slane %v750_v5, 1 }
 0x220   : > { %v752_v10 = vadd.f32 %v751_v8, %v750_v5 }
 0x221   : > { %v660_v12 = vpop.permute.xlu1 %659 }
 0x222   : > { %v808_v13 = vmul.f32 %v792_v11, %v752_v10  ;;  %v709_v14 = vsel %vm589_vm5, %v660_v12, 0.0 }
 0x223   : > { %v754_v16 = vsel %vm716_vm13, %v709_v14, 0.0 }
 0x224   : > { %v827_v17 = vrot.slane %v808_v13, 5  ;;  %v755_v18 = vadd.f32 %v754_v16, %v753_v15  ;;  %v796_v15 = vrot.slane %v1696_v34, 7 }
 0x226   : > { %v756_v19 = vrot.slane %v755_v18, 4  ;;  %v829_v20 = vsel %vm828_vm6, %v827_v17, %v826_v7 }
 0x228   : > { %v757_v44 = vadd.f32 %v756_v19, %v755_v18 }
 0x229   : > { %v693_v61 = vpop.permute.xlu2 %692 }
 0x22a   : > { %v758_v21 = vrot.slane %v757_v44, 2  ;;  %v714_v63 = vsel %vm594_vm14, %v693_v61, 0.0 }
 0x22b   : > { %v780_v2 = vsel %vm716_vm13, %v714_v63, 0.0 }
 0x22c   : > { %v759_v22 = vadd.f32 %v758_v21, %v757_v44 }
 0x22e   : > { %v760_v24 = vrot.slane %v759_v22, 1 }
 0x230   : > { %v761_v26 = vadd.f32 %v760_v24, %v759_v22 }
 0x231   : > { %v667_v28 = vpop.permute.xlu1 %666 }
 0x232   : > { %v809_v29 = vmul.f32 %v793_v27, %v761_v26  ;;  %v710_v30 = vsel %vm590_vm7, %v667_v28, 0.0 }
 0x233   : > { %v762_v32 = vsel %vm716_vm13, %v710_v30, 0.0 }
 0x234   : > { %v830_v33 = vrot.slane %v809_v29, 4  ;;  %v764_v35 = vadd.f32 %v763_v31, %v762_v32 }
 0x236   : > { %v765_v38 = vrot.slane %v764_v35, 4  ;;  %v832_v36 = vsel %vm831_vm8, %v830_v33, %v829_v20 }
 0x238   : > { %v766_v41 = vadd.f32 %v765_v38, %v764_v35 }
 0x23a   : > { %v767_v40 = vrot.slane %v766_v41, 2 }
 0x23c   : > { %v768_v43 = vadd.f32 %v767_v40, %v766_v41 }
 0x23e   : > { %v769_v53 = vrot.slane %v768_v43, 1 }
 0x240   : > { %v770_v48 = vadd.f32 %v769_v53, %v768_v43 }
 0x241   : > { %v686_v55 = vpop.permute.xlu1 %685 }
 0x242   : > { %v810_v56 = vmul.f32 %v794_v51, %v770_v48  ;;  %v713_v57 = vsel %vm593_vm11, %v686_v55, 0.0 }
 0x243   : > { %v772_v37 = vsel %vm716_vm13, %v713_v57, 0.0 }
 0x244   : > { %v773_v59 = vadd.f32 %v772_v37, %v771_v58  ;;  %v833_v60 = vrot.slane %v810_v56, 3 }
 0x246   : > { %v774_v62 = vrot.slane %v773_v59, 4  ;;  %v835_v50 = vsel %vm834_vm12, %v833_v60, %v832_v36 }
 0x248   : > { %v775_v0 = vadd.f32 %v774_v62, %v773_v59 }
 0x249   : > { %v699_v49 = vpop.permute.xlu1 %698 }
 0x24a   : > { %v776_v42 = vrot.slane %v775_v0, 2  ;;  %v715_v1 = vsel %vm595_vm15, %v699_v49, 0.0 }
 0x24b   : > { %v781_v3 = vsel %vm716_vm13, %v715_v1, 0.0 }
 0x24c   : > { %v777_v4 = vadd.f32 %v776_v42, %v775_v0  ;;  %v782_v5 = vadd.f32 %v781_v3, %v780_v2 }
 0x24e   : > { %v778_v6 = vrot.slane %v777_v4, 1  ;;  %v783_v7 = vrot.slane %v782_v5, 4 }
 0x250   : > { %v779_v8 = vadd.f32 %v778_v6, %v777_v4  ;;  %v784_v9 = vadd.f32 %v783_v7, %v782_v5 }
 0x252   : > { %v785_v10 = vrot.slane %v784_v9, 2  ;;  %v811_v11 = vmul.f32 %v795_v54, %v779_v8 }
 0x254   : > { %v786_v25 = vadd.f32 %v785_v10, %v784_v9  ;;  %v836_v52 = vrot.slane %v811_v11, 2 }
 0x256   : > { %v787_v12 = vrot.slane %v786_v25, 1  ;;  %v838_v13 = vsel %vm837_vm0, %v836_v52, %v835_v50 }
 0x258   : > { %v788_v14 = vadd.f32 %v787_v12, %v786_v25 }
 0x25a   : > { %v812_v16 = vmul.f32 %v796_v15, %v788_v14 }
 0x25c   : > { %v839_v17 = vrot.slane %v812_v16, 1 }
 0x25e   : > { %v841_v18 = vsel %vm840_vm2, %v839_v17, %v838_v13 }
 0x25f   : > { %1043 = vmatmul.msk.f32.vlgmr.msra.gmra.mxu2 %vm716_vm13, %v841_v18 }
 0x2e2   : > { %v865_v19 = vpop.f32.mrf.mxu2 }
 0x2e3   : > { %868 = vst.msk [vmem:[%s377_s11] sm:$0xff] %vm419_vm1, %v865_v19 }
 0x2e4   : > { %1333 = shalt.err (!%p1330_p2)
}
 0x2e5   : > { %1065 = dma.vmem_to_hbm [thread:$0]  (%p1498_p7), %s883_s13, 128, %s885_s16, %s870_s17  }
 0x2e6 PF: > { %s896_s23 = sand.u32 1, %s1368_s21   ;;  %p1811_p10 = scmp.ge.s32.totalorder %s1380_s24, 2 }
 0x2e7   : > { %s897_s8 = scalar_lea.sflag [#allocation4], %s896_s23 }
 0x2e8   : > { %p1085_p13 = pnand %p1811_p10, %p1457_p6 }
 0x2ea   : > { %p1086_p0 = pneg %p1085_p13 }
 0x2ec   : > { %1363 = dma.done.wait (%p1086_p0), %s897_s8, 128  }
 0x2ed   : > { %1365 = vsyncadd (%p1086_p0), %s897_s8, 4294967168  ;;  %s1812_s24 = sld [smem:[#allocation18_spill]]  ;;  %s1815_s21 = smov %s1372_s22 }
 0x2ee   : > { %s1813_s26 = sld [smem:[#allocation16_spill]] }
 0x2ef   : > { %s1814_s23 = sld [smem:[#allocation19_spill]] }
 0x2f3   : > { %p23_p8 = scmp.ge.s32.totalorder %s1812_s24, 4  }
 0x2f4   : > { %s1816_s22 = smov %s1813_s26 }
 0x2f5   :  { %25 = sbr.rel (!%p23_p8) target bundleno = 12 (0xc), region = 121 }
 0x2fa   :  { %903 = vsyncpa [#allocation3], 1 }
 0x2fb   :  { %905 = vsyncpa [#allocation3 + $0x1], 1 }
 0x2fc   :  { %906 = vsyncpa [#allocation6], 1 }
 0x2fd   :  { %908 = vsyncpa [#allocation6 + $0x1], 1 }
 0x2fe   :  { %909 = vsyncpa [#allocation9], 1 }
 0x2ff   :  { %910 = vsyncpa [#allocation4], 1 }
 0x300   :  { %912 = vsyncpa [#allocation4 + $0x1], 1 }

</bundles_post_ra>
